<compile_context>
chip_gen: v5e
topology: v5e:2x2
jax: 0.10.0
libtpu: 0.0.40
codegen_flags: <defaults>
</compile_context>

<pallas_src>
import functools
import math

import jax
import jax.numpy as jnp
from jax import lax
from jax.experimental import pallas as pl
from jax.experimental.pallas import tpu as pltpu


_HALO = 8  # halo rows per tile side; >= number of stacked k=3 convs (3), multiple of 8


def _round_up(x, m):
    return ((x + m - 1) // m) * m


def _conv_k3(h, w_ref, b_ref):
    """Conv1d (kernel=3, padding=1, cross-correlation) as a single MXU matmul.

    h: (L, C_in) float32.  w_ref: (3*C_in, C_out) bf16, rows ordered tap-major
    (k=0 rows first) to match the slab below.  b_ref: (1, C_out) float32.
    Rows 0 and L-1 of the result are garbage (roll wrap) but always lie inside
    the halo region and are never stored.
    """
    L = h.shape[0]
    h_m1 = pltpu.roll(h, 1, axis=0)        # row t holds h[t-1]  (tap k=0)
    h_p1 = pltpu.roll(h, L - 1, axis=0)    # row t holds h[t+1]  (tap k=2)
    slab = jnp.concatenate([h_m1, h, h_p1], axis=1).astype(jnp.bfloat16)
    out = jnp.dot(slab, w_ref[...], preferred_element_type=jnp.float32)
    return out + b_ref[...]


def cls_head_kernel(x_ref, m_ref, w1_ref, b1_ref, w2_ref, b2_ref,
                    w3_ref, b3_ref, o_ref, *, halo, t_blk):
    m = m_ref[...]                          # (L, 1) f32, zero in padded halo rows
    x = x_ref[...].astype(jnp.float32)      # (L, C_in)

    # head[0]: MaskedConv1D -> Identity norm -> ReLU
    h = jnp.maximum(_conv_k3(x, w1_ref, b1_ref) * m, 0.0)
    # head[1]: MaskedConv1D -> Identity norm -> ReLU
    h = jnp.maximum(_conv_k3(h, w2_ref, b2_ref) * m, 0.0)
    # cls_head: MaskedConv1D (feat -> padded num_classes); no activation on logits
    logits = _conv_k3(h, w3_ref, b3_ref) * m
    # TODO(synk): with_ln=True (LayerNorm between conv and ReLU) not implemented;
    # the module default with_ln=False uses nn.Identity, which is what is fused here.

    # Store only the sublane-aligned core rows (halo multiple of 8, t_blk multiple of 8).
    o_ref[...] = logits[halo:halo + t_blk, :].astype(o_ref.dtype)


def prepare_cls_head_params(torch_params, num_classes):
    """torch_params: PyTorch-layout conv weights w{1,2,3}: (C_out, C_in, 3),
    biases b{1,2,3}: (C_out,).  Returns kernel params: im2col-flattened bf16
    weights (3*C_in, C_out), f32 (1, C_out) biases, cls layer zero-padded to a
    multiple of 128 output channels for lane-dense MXU columns / stores."""
    def wio(w):                         # (C_out, C_in, K) -> (K, C_in, C_out)
        return jnp.transpose(w, (2, 1, 0))

    def flat(w):                        # (K, C_in, C_out) -> (K*C_in, C_out), tap-major rows
        K, ci, co = w.shape
        return w.reshape(K * ci, co)

    w1 = flat(wio(torch_params["w1"]))
    w2 = flat(wio(torch_params["w2"]))
    w3 = flat(wio(torch_params["w3"]))
    n_pad = _round_up(max(num_classes, 1), 128)
    w3p = jnp.zeros((w3.shape[0], n_pad), jnp.float32).at[:, :num_classes].set(w3)
    b3p = jnp.zeros((1, n_pad), jnp.float32).at[:, :num_classes].set(
        torch_params["b3"][None, :])
    return {
        "w1": w1.astype(jnp.bfloat16),
        "b1": torch_params["b1"][None, :].astype(jnp.float32),
        "w2": w2.astype(jnp.bfloat16),
        "b2": torch_params["b2"][None, :].astype(jnp.float32),
        "w3": w3p.astype(jnp.bfloat16),
        "b3": b3p,
        "num_classes": num_classes,
    }


def cls_head_level(x, mask, kp, *, t_blk=256):
    """x: (B, T, C_in) float, mask: (B, T, 1) float -> logits (B, T, num_classes) f32."""
    B, T, Cin = x.shape
    Fd = kp["w1"].shape[1]
    Np = kp["w3"].shape[1]
    ncls = kp["num_classes"]
    assert kp["w1"].shape[0] == 3 * Cin

    t_blk = max(8, min(_round_up(t_blk, 8), _round_up(T, 8)))
    nT = pl.cdiv(T, t_blk)
    T_core = nT * t_blk
    L = t_blk + 2 * _HALO

    # Zero-pad time: _HALO rows front, (T_core - T + _HALO) rows back.  Zero mask
    # rows make the halo intermediates exactly equal to the conv's zero padding,
    # so tile seams and sequence edges need no in-kernel special-casing.
    pad = ((0, 0), (_HALO, T_core - T + _HALO), (0, 0))
    x_pad = jnp.pad(x.astype(jnp.bfloat16), pad)
    m_pad = jnp.pad(mask.astype(jnp.float32), pad)

    # Overlapping (halo'd) time windows, materialized so BlockSpecs stay Blocked.
    x_win = jnp.stack([lax.dynamic_slice_in_dim(x_pad, i * t_blk, L, axis=1)
                       for i in range(nT)], axis=1)          # (B, nT, L, Cin)
    m_win = jnp.stack([lax.dynamic_slice_in_dim(m_pad, i * t_blk, L, axis=1)
                       for i in range(nT)], axis=1)          # (B, nT, L, 1)

    kernel = functools.partial(cls_head_kernel, halo=_HALO, t_blk=t_blk)
    wmap = lambda b, t: (0, 0)   # weights/biases: constant index map (stay resident)

    out = pl.pallas_call(
        kernel,
        out_shape=jax.ShapeDtypeStruct((B, T_core, Np), jnp.float32),
        grid_spec=pl.GridSpec(
            grid=(B, nT),
            in_specs=[
                pl.BlockSpec((pl.Squeezed(), pl.Squeezed(), L, Cin),
                             lambda b, t: (b, t, 0, 0)),             # x window
                pl.BlockSpec((pl.Squeezed(), pl.Squeezed(), L, 1),
                             lambda b, t: (b, t, 0, 0)),             # mask window
                pl.BlockSpec((3 * Cin, Fd), wmap),                   # w1 (im2col)
                pl.BlockSpec((1, Fd), wmap),                         # b1
                pl.BlockSpec((3 * Fd, Fd), wmap),                    # w2
                pl.BlockSpec((1, Fd), wmap),                         # b2
                pl.BlockSpec((3 * Fd, Np), wmap),                    # w3 (class-padded)
                pl.BlockSpec((1, Np), wmap),                         # b3 (class-padded)
            ],
            out_specs=pl.BlockSpec((pl.Squeezed(), t_blk, Np),
                                   lambda b, t: (b, t, 0)),          # lane-dense output
        ),
        compiler_params=pltpu.CompilerParams(
            dimension_semantics=("parallel", "parallel"),
            vmem_limit_bytes=32 * 1024 * 1024,
        ),
        # NOTE: on v7x (64 MiB VMEM) with Fd=512 and long T, additionally consider
        # pipeline_mode=pl.Buffered(1) on the constant-index weight specs.
    )(x_win, m_win, kp["w1"], kp["b1"], kp["w2"], kp["b2"], kp["w3"], kp["b3"])

    return out[:, :T, :ncls]


def cls_head_forward(fpn_feats, fpn_masks, kp, *, t_blk=256):
    assert len(fpn_feats) == len(fpn_masks)
    out_logits = tuple()
    for feat, mask in zip(fpn_feats, fpn_masks):
        out_logits += (cls_head_level(feat, mask, kp, t_blk=t_blk),)
    return out_logits


# ---------------- pure-JAX f32 reference (for validation) ----------------
def _ref_conv(h, w_wio, b):
    out = lax.conv_general_dilated(h, w_wio, window_strides=(1,), padding="SAME",
                                   dimension_numbers=("NWC", "WIO", "NWC"))
    return out + b[None, None, :]


def ref_cls_head_level(x, mask, tp):
    wio = lambda w: jnp.transpose(w, (2, 1, 0))
    h = jax.nn.relu(_ref_conv(x, wio(tp["w1"]), tp["b1"]) * mask)
    h = jax.nn.relu(_ref_conv(h, wio(tp["w2"]), tp["b2"]) * mask)
    return _ref_conv(h, wio(tp["w3"]), tp["b3"]) * mask


if __name__ == "__main__":
    B = 2
    input_dim = 128      # 128-wide channels keep every vreg lane busy
    feat_dim = 128
    num_classes = 20
    prior_prob = 0.01
    Ts = [80, 40]        # FPN level lengths (exercise T % t_blk != 0 and multi-tile seams)

    key = jax.random.PRNGKey(0)
    keys = jax.random.split(key, 10)

    bias_value = -math.log((1 - prior_prob) / prior_prob)
    # PyTorch-layout parameters (shared across FPN levels, like the module)
    torch_params = {
        "w1": 0.05 * jax.random.normal(keys[0], (feat_dim, input_dim, 3), jnp.float32),
        "b1": 0.05 * jax.random.normal(keys[1], (feat_dim,), jnp.float32),
        "w2": 0.05 * jax.random.normal(keys[2], (feat_dim, feat_dim, 3), jnp.float32),
        "b2": 0.05 * jax.random.normal(keys[3], (feat_dim,), jnp.float32),
        "w3": 0.05 * jax.random.normal(keys[4], (num_classes, feat_dim, 3), jnp.float32),
        "b3": jnp.full((num_classes,), bias_value, jnp.float32),  # prior_prob init
    }
    kp = prepare_cls_head_params(torch_params, num_classes)

    fpn_feats, fpn_masks = [], []
    for l, T in enumerate(Ts):
        fpn_feats.append(jax.random.normal(keys[5 + l], (B, T, input_dim), jnp.float32))
        # valid lengths differ per batch element to exercise masking
        valid_len = jnp.array([T, max((3 * T) // 5, 1)], jnp.int32)
        t_idx = jnp.arange(T)[None, :, None]                       # (1, T, 1)
        fpn_masks.append((t_idx < valid_len[:, None, None]).astype(jnp.float32))

    # Small time tiles so the grid has multiple time blocks per batch element.
    outs = cls_head_forward(fpn_feats, fpn_masks, kp, t_blk=32)
    outs = jax.block_until_ready(outs)

    # Validate against the pure-JAX f32 reference (bf16 matmul operands -> loose tol).
    for l, T in enumerate(Ts):
        ref = ref_cls_head_level(fpn_feats[l], fpn_masks[l], torch_params)
        assert outs[l].shape == (B, T, num_classes), outs[l].shape
        assert jnp.allclose(outs[l], ref, atol=1e-1, rtol=5e-2), (
            f"level {l}: max abs diff {jnp.max(jnp.abs(outs[l] - ref))}")

    print("KERNEL_OK")
</pallas_src>

<mosaic_0001>
module attributes {stable_mosaic.version = 11 : i64} {
  func.func @cls_head_kernel(%arg0: i32, %arg1: i32, %arg2: memref<1x1x48x128xbf16, #tpu.memory_space<vmem>>, %arg3: memref<1x1x48x1xf32, #tpu.memory_space<vmem>>, %arg4: memref<384x128xbf16, #tpu.memory_space<vmem>>, %arg5: memref<1x128xf32, #tpu.memory_space<vmem>>, %arg6: memref<384x128xbf16, #tpu.memory_space<vmem>>, %arg7: memref<1x128xf32, #tpu.memory_space<vmem>>, %arg8: memref<384x128xbf16, #tpu.memory_space<vmem>>, %arg9: memref<1x128xf32, #tpu.memory_space<vmem>>, %arg10: memref<1x32x128xf32, #tpu.memory_space<vmem>>) attributes {dimension_semantics = [#tpu.dimension_semantics<parallel>, #tpu.dimension_semantics<parallel>], iteration_bounds = array<i64: 2, 3>, scalar_prefetch = 0 : i64, scratch_operands = 0 : i64, tpu.core_type = #tpu.core_type<tc>, window_params = [{transform_indices = @transform_0, window_bounds = array<i64: 1, 1, 48, 128>}, {transform_indices = @transform_1, window_bounds = array<i64: 1, 1, 48, 1>}, {pipeline_mode = #tpu.pipeline_mode<synchronous>, transform_indices = @transform_2, window_bounds = array<i64: 384, 128>}, {pipeline_mode = #tpu.pipeline_mode<synchronous>, transform_indices = @transform_3, window_bounds = array<i64: 1, 128>}, {pipeline_mode = #tpu.pipeline_mode<synchronous>, transform_indices = @transform_4, window_bounds = array<i64: 384, 128>}, {pipeline_mode = #tpu.pipeline_mode<synchronous>, transform_indices = @transform_5, window_bounds = array<i64: 1, 128>}, {pipeline_mode = #tpu.pipeline_mode<synchronous>, transform_indices = @transform_6, window_bounds = array<i64: 384, 128>}, {pipeline_mode = #tpu.pipeline_mode<synchronous>, transform_indices = @transform_7, window_bounds = array<i64: 1, 128>}, {transform_indices = @transform_8, window_bounds = array<i64: 1, 32, 128>}]} {
    %c0 = arith.constant 0 : index
    %c0_0 = arith.constant 0 : index
    %c0_1 = arith.constant 0 : index
    %c0_2 = arith.constant 0 : index
    %0 = vector.load %arg3[%c0, %c0_0, %c0_1, %c0_2] : memref<1x1x48x1xf32, #tpu.memory_space<vmem>>, vector<1x1x48x1xf32>
    %1 = vector.shape_cast %0 : vector<1x1x48x1xf32> to vector<48x1xf32>
    %c0_3 = arith.constant 0 : index
    %c0_4 = arith.constant 0 : index
    %c0_5 = arith.constant 0 : index
    %c0_6 = arith.constant 0 : index
    %2 = vector.load %arg2[%c0_3, %c0_4, %c0_5, %c0_6] : memref<1x1x48x128xbf16, #tpu.memory_space<vmem>>, vector<1x1x48x128xbf16>
    %3 = vector.shape_cast %2 : vector<1x1x48x128xbf16> to vector<48x128xbf16>
    %4 = arith.extf %3 : vector<48x128xbf16> to vector<48x128xf32>
    %c1_i32 = arith.constant 1 : i32
    %5 = tpu.dynamic_rotate %4 by %c1_i32 dim 0 : vector<48x128xf32>, i32 -> vector<48x128xf32>
    %c47_i32 = arith.constant 47 : i32
    %6 = tpu.dynamic_rotate %4 by %c47_i32 dim 0 : vector<48x128xf32>, i32 -> vector<48x128xf32>
    %7 = tpu.concatenate %5, %4, %6 in 1 : vector<48x128xf32>, vector<48x128xf32>, vector<48x128xf32> -> vector<48x384xf32>
    %8 = arith.truncf %7 : vector<48x384xf32> to vector<48x384xbf16>
    %c0_7 = arith.constant 0 : index
    %c0_8 = arith.constant 0 : index
    %9 = vector.load %arg4[%c0_7, %c0_8] : memref<384x128xbf16, #tpu.memory_space<vmem>>, vector<384x128xbf16>
    %cst = arith.constant dense<0.000000e+00> : vector<48x128xf32>
    %10 = tpu.matmul %8, %9, %cst {dimension_numbers = #tpu.dot_dimension_numbers<[1], [0], [0], [1], [0, 0, 1, 1], [], []>} : vector<48x384xbf16>, vector<384x128xbf16>, vector<48x128xf32> -> vector<48x128xf32>
    %c0_9 = arith.constant 0 : index
    %c0_10 = arith.constant 0 : index
    %11 = vector.load %arg5[%c0_9, %c0_10] : memref<1x128xf32, #tpu.memory_space<vmem>>, vector<1x128xf32>
    %12 = vector.broadcast %11 : vector<1x128xf32> to vector<48x128xf32>
    %13 = arith.addf %10, %12 : vector<48x128xf32>
    %14 = vector.broadcast %1 : vector<48x1xf32> to vector<48x128xf32>
    %15 = arith.mulf %13, %14 : vector<48x128xf32>
    %cst_11 = arith.constant 0.000000e+00 : f32
    %16 = vector.broadcast %cst_11 : f32 to vector<48x128xf32>
    %17 = arith.maximumf %15, %16 : vector<48x128xf32>
    %c1_i32_12 = arith.constant 1 : i32
    %18 = tpu.dynamic_rotate %17 by %c1_i32_12 dim 0 : vector<48x128xf32>, i32 -> vector<48x128xf32>
    %c47_i32_13 = arith.constant 47 : i32
    %19 = tpu.dynamic_rotate %17 by %c47_i32_13 dim 0 : vector<48x128xf32>, i32 -> vector<48x128xf32>
    %20 = tpu.concatenate %18, %17, %19 in 1 : vector<48x128xf32>, vector<48x128xf32>, vector<48x128xf32> -> vector<48x384xf32>
    %21 = arith.truncf %20 : vector<48x384xf32> to vector<48x384xbf16>
    %c0_14 = arith.constant 0 : index
    %c0_15 = arith.constant 0 : index
    %22 = vector.load %arg6[%c0_14, %c0_15] : memref<384x128xbf16, #tpu.memory_space<vmem>>, vector<384x128xbf16>
    %cst_16 = arith.constant dense<0.000000e+00> : vector<48x128xf32>
    %23 = tpu.matmul %21, %22, %cst_16 {dimension_numbers = #tpu.dot_dimension_numbers<[1], [0], [0], [1], [0, 0, 1, 1], [], []>} : vector<48x384xbf16>, vector<384x128xbf16>, vector<48x128xf32> -> vector<48x128xf32>
    %c0_17 = arith.constant 0 : index
    %c0_18 = arith.constant 0 : index
    %24 = vector.load %arg7[%c0_17, %c0_18] : memref<1x128xf32, #tpu.memory_space<vmem>>, vector<1x128xf32>
    %25 = vector.broadcast %24 : vector<1x128xf32> to vector<48x128xf32>
    %26 = arith.addf %23, %25 : vector<48x128xf32>
    %27 = vector.broadcast %1 : vector<48x1xf32> to vector<48x128xf32>
    %28 = arith.mulf %26, %27 : vector<48x128xf32>
    %cst_19 = arith.constant 0.000000e+00 : f32
    %29 = vector.broadcast %cst_19 : f32 to vector<48x128xf32>
    %30 = arith.maximumf %28, %29 : vector<48x128xf32>
    %c1_i32_20 = arith.constant 1 : i32
    %31 = tpu.dynamic_rotate %30 by %c1_i32_20 dim 0 : vector<48x128xf32>, i32 -> vector<48x128xf32>
    %c47_i32_21 = arith.constant 47 : i32
    %32 = tpu.dynamic_rotate %30 by %c47_i32_21 dim 0 : vector<48x128xf32>, i32 -> vector<48x128xf32>
    %33 = tpu.concatenate %31, %30, %32 in 1 : vector<48x128xf32>, vector<48x128xf32>, vector<48x128xf32> -> vector<48x384xf32>
    %34 = arith.truncf %33 : vector<48x384xf32> to vector<48x384xbf16>
    %c0_22 = arith.constant 0 : index
    %c0_23 = arith.constant 0 : index
    %35 = vector.load %arg8[%c0_22, %c0_23] : memref<384x128xbf16, #tpu.memory_space<vmem>>, vector<384x128xbf16>
    %cst_24 = arith.constant dense<0.000000e+00> : vector<48x128xf32>
    %36 = tpu.matmul %34, %35, %cst_24 {dimension_numbers = #tpu.dot_dimension_numbers<[1], [0], [0], [1], [0, 0, 1, 1], [], []>} : vector<48x384xbf16>, vector<384x128xbf16>, vector<48x128xf32> -> vector<48x128xf32>
    %c0_25 = arith.constant 0 : index
    %c0_26 = arith.constant 0 : index
    %37 = vector.load %arg9[%c0_25, %c0_26] : memref<1x128xf32, #tpu.memory_space<vmem>>, vector<1x128xf32>
    %38 = vector.broadcast %37 : vector<1x128xf32> to vector<48x128xf32>
    %39 = arith.addf %36, %38 : vector<48x128xf32>
    %40 = vector.broadcast %1 : vector<48x1xf32> to vector<48x128xf32>
    %41 = arith.mulf %39, %40 : vector<48x128xf32>
    %42 = vector.extract_strided_slice %41 {offsets = [8, 0], sizes = [32, 128], strides = [1, 1]} : vector<48x128xf32> to vector<32x128xf32>
    %c0_27 = arith.constant 0 : index
    %c0_28 = arith.constant 0 : index
    %c0_29 = arith.constant 0 : index
    %43 = vector.load %arg10[%c0_27, %c0_28, %c0_29] : memref<1x32x128xf32, #tpu.memory_space<vmem>>, vector<1x32x128xf32>
    %44 = vector.shape_cast %43 : vector<1x32x128xf32> to vector<32x128xf32>
    %45 = vector.shape_cast %42 : vector<32x128xf32> to vector<1x32x128xf32>
    tpu.vector_store %arg10[%c0_27, %c0_28, %c0_29], %45 {strides = array<i32>} : memref<1x32x128xf32, #tpu.memory_space<vmem>>, vector<1x32x128xf32>,
    return
  }
  func.func @transform_0(%arg0: i32, %arg1: i32) -> (i32, i32, i32, i32) {
    %c0_i32 = arith.constant 0 : i32
    %c0_i32_0 = arith.constant 0 : i32
    %c0_i32_1 = arith.constant 0 : i32
    return %arg0, %arg1, %c0_i32, %c0_i32_0 : i32, i32, i32, i32
  }
  func.func @transform_1(%arg0: i32, %arg1: i32) -> (i32, i32, i32, i32) {
    %c0_i32 = arith.constant 0 : i32
    %c0_i32_0 = arith.constant 0 : i32
    %c0_i32_1 = arith.constant 0 : i32
    return %arg0, %arg1, %c0_i32, %c0_i32_0 : i32, i32, i32, i32
  }
  func.func @transform_2(%arg0: i32, %arg1: i32) -> (i32, i32) {
    %c0_i32 = arith.constant 0 : i32
    %c0_i32_0 = arith.constant 0 : i32
    %c0_i32_1 = arith.constant 0 : i32
    return %c0_i32, %c0_i32_0 : i32, i32
  }
  func.func @transform_3(%arg0: i32, %arg1: i32) -> (i32, i32) {
    %c0_i32 = arith.constant 0 : i32
    %c0_i32_0 = arith.constant 0 : i32
    %c0_i32_1 = arith.constant 0 : i32
    return %c0_i32, %c0_i32_0 : i32, i32
  }
  func.func @transform_4(%arg0: i32, %arg1: i32) -> (i32, i32) {
    %c0_i32 = arith.constant 0 : i32
    %c0_i32_0 = arith.constant 0 : i32
    %c0_i32_1 = arith.constant 0 : i32
    return %c0_i32, %c0_i32_0 : i32, i32
  }
  func.func @transform_5(%arg0: i32, %arg1: i32) -> (i32, i32) {
    %c0_i32 = arith.constant 0 : i32
    %c0_i32_0 = arith.constant 0 : i32
    %c0_i32_1 = arith.constant 0 : i32
    return %c0_i32, %c0_i32_0 : i32, i32
  }
  func.func @transform_6(%arg0: i32, %arg1: i32) -> (i32, i32) {
    %c0_i32 = arith.constant 0 : i32
    %c0_i32_0 = arith.constant 0 : i32
    %c0_i32_1 = arith.constant 0 : i32
    return %c0_i32, %c0_i32_0 : i32, i32
  }
  func.func @transform_7(%arg0: i32, %arg1: i32) -> (i32, i32) {
    %c0_i32 = arith.constant 0 : i32
    %c0_i32_0 = arith.constant 0 : i32
    %c0_i32_1 = arith.constant 0 : i32
    return %c0_i32, %c0_i32_0 : i32, i32
  }
  func.func @transform_8(%arg0: i32, %arg1: i32) -> (i32, i32, i32) {
    %c0_i32 = arith.constant 0 : i32
    %c0_i32_0 = arith.constant 0 : i32
    return %arg0, %arg1, %c0_i32 : i32, i32, i32
  }
}

</mosaic_0001>

<bundles_post_ra>
// kernel: tpu_custom_call.1
= control target key start
LH: loop header
LB: loop body
LE: loop exit
PB: predicated region body
PF: predicated region fallthrough
CT: control target
= control target key end

     0   :  { %s2807_s0 = inlined_call_operand.hbm [shape: bf16[2,3,48,128], index: 0, kind: input, shape index: {}]   ;;  %s2808_s1 = inlined_call_operand.vmem [shape: f32[2,3,48,1], index: 1, kind: input, shape index: {}]   ;;  %s2809_s2 = inlined_call_operand.vmem [shape: bf16[384,128], index: 2, kind: input, shape index: {}]   ;;  %s2810_s3 = inlined_call_operand.vmem [shape: f32[1,128], index: 3, kind: input, shape index: {}]   ;;  %s2811_s4 = inlined_call_operand.hbm [shape: bf16[384,128], index: 4, kind: input, shape index: {}]   ;;  %s2812_s5 = inlined_call_operand.vmem [shape: f32[1,128], index: 5, kind: input, shape index: {}]   ;;  %s2813_s6 = inlined_call_operand.hbm [shape: bf16[384,128], index: 6, kind: input, shape index: {}]   ;;  %s2814_s7 = inlined_call_operand.vmem [shape: f32[1,128], index: 7, kind: input, shape index: {}]   ;;  %s2815_s8 = inlined_call_operand.hbm [shape: f32[2,96,128], index: 8, kind: output, shape index: {}]  }
   0x1   :  { %2828 = sst [smem:[#allocation19_spill]] %s2810_s3 }
   0x2   :  { %2829 = sst [smem:[#allocation20_spill]] %s2811_s4 }
   0x3   :  { %2830 = sst [smem:[#allocation21_spill]] %s2812_s5 }
   0x4   :  { %2831 = sst [smem:[#allocation22_spill]] %s2813_s6 }
   0x5   :  { %2832 = sst [smem:[#allocation23_spill]] %s2814_s7 }
   0x6   :  { %2833 = sst [smem:[#allocation24_spill]] %s2815_s8 }
   0x7   :  { %13 = vsyncpa [#allocation3], 0 }
   0x8   :  { %15 = vsyncpa [#allocation3 + $0x1], 0 }
   0x9   :  { %16 = vsyncpa [#allocation6], 0 }
   0xa   :  { %17 = vsyncpa [#allocation4], 0 }
   0xb   :  { %19 = vsyncpa [#allocation4 + $0x1], 0  ;;  %s2311_s27 = smov 0   ;;  %s2313_s28 = smov 0  }
   0xc   :  { %s2315_s29 = smov 0   ;;  %s2317_s30 = smov 0  }
   0xd   :  { %s2319_s9 = smov 0   ;;  %s2321_s10 = smov 0  }
   0xe   :  { %s2323_s11 = smov 0   ;;  %s2325_s12 = smov 0  }
   0xf LB: > { %2834 = sst [smem:[#allocation12_spill]] %s2229_s27  ;;  %s1541_s13 = sadd.s32 4294967295, %s2257_s12   ;;  %s2257_s12 = sphi %s2325_s12, %s25_s12   ;;  %s2253_s11 = sphi %s2323_s11, %s2865_s11   ;;  %s2249_s10 = sphi %s2321_s10, %s2859_s10   ;;  %s2245_s9 = sphi %s2319_s9, %s2864_s9   ;;  %s2241_s30 = sphi %s2317_s30, %s2858_s30   ;;  %s2237_s29 = sphi %s2315_s29, %s2863_s29   ;;  %s2233_s28 = sphi %s2313_s28, %s2862_s28   ;;  %s2229_s27 = sphi %s2311_s27, %s2861_s27  }
  0x10   : > { %2835 = sst [smem:[#allocation13_spill]] %s2249_s10  ;;  %s1542_s14 = sadd.s32 4294967294, %s2257_s12  }
  0x11   : > { %2836 = sst [smem:[#allocation14_spill]] %s2257_s12  ;;  %p59_p0 = scmp.ne.s32.totalorder %s2233_s28, %s2229_s27 }
  0x12   : > { %p2357_p1 = scmp.eq.s32.totalorder %s1541_s13, 0  ;;  %p245_p2 = scmp.eq.s32.totalorder %s1542_s14, 5 }
  0x13   : > { %p1543_p4 = scmp.ge.s32.totalorder %s2257_s12, 1  ;;  %p252_p6 = scmp.lt.s32.totalorder %s2257_s12, 7 }
  0x14   : > { %p2363_p3 = por %p2357_p1, %p59_p0  ;;  %p2368_p5 = por %p245_p2, %p59_p0 }
  0x15   : > { %s2841_s4 = sld [smem:[#allocation20_spill]]  ;;  %p2376_p7 = pnand %p1543_p4, %p252_p6 }
  0x16   : > { %s2839_s17 = scalar_select %p2368_p5, 1, 0 }
  0x17   : > { %p1967_p8 = pneg %p2376_p7  ;;  %s2259_s22 = smov [#allocation5]  }
  0x18   : > { %2840 = sst [smem:[#allocation15_spill]] %s2839_s17  ;;  %s271_s23 = sshll.u32 %s2259_s22, 4  ;;  %s272_s23 = int_to_ptr.vmem [resolvable:$true] %s271_s23 }
  0x19   : > { %p1968_p9 = pnand %p1967_p8, %p2357_p1  ;;  %s2843_s6 = sld [smem:[#allocation22_spill]] }
  0x1a   : > { %s2816_s14 = smov 64   ;;  %s2817_s18 = smov 4  }
  0x1b   : > { %s269_s20 = sshll.u32 %s2841_s4, 4  ;;  %s2262_s19 = smov [#allocation7]   ;;  %s270_s20 = int_to_ptr.hbm [resolvable:$true] %s269_s20 }
  0x1c   : > { %1970 = dma.hbm_to_vmem [thread:$0]  (!%p1968_p9), %s270_s20, 3072, %s272_s23, [#allocation6], %s2816_s14, %s2816_s14, %s2817_s18  }
  0x1d   : > { %s288_s22 = sshll.u32 %s2262_s19, 4  ;;  %p239_p10 = scmp.eq.s32.totalorder %s1541_s13, 5  ;;  %s289_s22 = int_to_ptr.vmem [resolvable:$true] %s288_s22 }
  0x1e   : > { %s34_s24 = sadd.s32 1, %s2249_s10  ;;  %s37_s25 = sadd.s32 1, %s2253_s11 }
  0x1f   : > { %s286_s26 = sshll.u32 %s2843_s6, 4  ;;  %p35_p11 = scmp.ge.s32.totalorder %s34_s24, 3  ;;  %s287_s26 = int_to_ptr.hbm [resolvable:$true] %s286_s26 }
  0x20   : > { %1973 = dma.hbm_to_vmem [thread:$0]  (!%p1968_p9), %s287_s26, 3072, %s289_s22, [#allocation6], %s2816_s14, %s2816_s14, %s2817_s18  }
  0x21   : > { %p53_p12 = scmp.ne.s32.totalorder %s2237_s29, %s2233_s28  ;;  %p54_p13 = scmp.eq.s32.totalorder %s2257_s12, 0 }
  0x22   : > { %s2867_s24 = smov (%p35_p11, %s34_s24), 0  ;;  %s2869_s25 = smov (!%p35_p11, %s37_s25), %s2253_s11 }
  0x23   : > { %2844 = sst [smem:[#allocation16_spill]] %s2867_s24  ;;  %s42_s20 = ssub.s32 %s2249_s10, %s2867_s24 }
  0x24   : > { %s46_s23 = sadd.s32 1, %s2237_s29  ;;  %p39_p0 = scmp.ge.s32.totalorder %s2869_s25, 2 }
  0x25   : > { %p2406_p2 = por %p239_p10, %p53_p12  ;;  %p55_p4 = por %p54_p13, %p53_p12 }
  0x26   : > { %s305_s13 = sand.u32 1, %s2237_s29   ;;  %s2871_s25 = smov (%p39_p0, %s2869_s25), 0 }
  0x27   : > { %s2845_s26 = scalar_select %p2406_p2, 1, 0 }
  0x28   : > { %2847 = sst [smem:[#allocation18_spill]] %s2871_s25  ;;  %p1984_p6 = scmp.lt.s32.totalorder %s2257_s12, 6 }
  0x29   : > { %2846 = sst [smem:[#allocation17_spill]] %s2845_s26  ;;  %s1948_s19 = smul.u32 24, %s305_s13 }
  0x2a   : > { %s41_s22 = ssub.s32 %s2253_s11, %s2871_s25  ;;  %s1949_s14 = smul.u32 6, %s2249_s10 }
  0x2b   : > { %s43_s18 = sor.u32 %s42_s20, %s41_s22  ;;  %s1950_s4 = smul.u32 18, %s2253_s11 }
  0x2c   : > { %p44_p8 = scmp.eq.s32.totalorder %s43_s18, 0  ;;  %s309_s6 = scalar_lea.vmem [#allocation2], %s1948_s19 }
  0x2d   : > { %s319_s24 = sshll.u32 %s309_s6, 4  ;;  %p1975_p9 = pnand %p1984_p6, %p55_p4  ;;  %s320_s24 = int_to_ptr.vmem [resolvable:$true] %s319_s24 }
  0x2e   : > { %s2419_s17 = scalar_select %p44_p8, %s2237_s29, %s46_s23  }
  0x2f   : > { %s314_s27 = sadd.s32 %s1950_s4, %s1949_s14  ;;  %s306_s12 = scalar_lea.sflag [#allocation3], %s305_s13 }
  0x30   : > { %s1547_s8 = sshll.u32 %s314_s27, 2  ;;  %s2848_s25 = smov 4  }
  0x31   : > { %s316_s5 = scalar_lea.hbm %s2807_s0, %s1547_s8  ;;  %s2849_s10 = smov 64  }
  0x32   : > { %s317_s3 = sshll.u32 %s316_s5, 4  ;;  %343 = sbr.rel (%p2376_p7) target bundleno = 677 (0x2a5), region = 52  ;;  %s318_s3 = int_to_ptr.hbm [resolvable:$true] %s317_s3 }
  0x33   : > { %1977 = dma.hbm_to_vmem [thread:$0]  (!%p1975_p9), %s318_s3, 384, %s320_s24, %s306_s12, %s2849_s10, %s2849_s10, %s2848_s25  }
  0x34   : > { %s2430_s6 = sand.u32 (!%p2376_p7), 1, %s2233_s28  }
  0x35   : > { %s1951_s4 = smul.u32 (!%p2376_p7), 24, %s2430_s6  ;;  %s346_s7 = scalar_lea.sflag (!%p2376_p7), [#allocation3], %s2430_s6 }
  0x37   : > { %s2434_s8 = scalar_lea.vmem [#allocation2], %s1951_s4 }
  0x38   : > { %2216 = dma.done.wait (%p2363_p3), %s346_s7, 384  }
  0x39   : > { %2218 = vsyncadd (%p2363_p3), %s346_s7, 4294966912 }
  0x3a   : > { %2220 = dma.done.wait (%p2357_p1), [#allocation6], 6144  }
  0x3b   : > { %2222 = vsyncadd (%p2357_p1), [#allocation6], 4294961152  ;;  %v1853_v0 = vld [vmem:[%s2809_s2 + $0x38] sm:$0xff]  ;;  %v1852_v2 = vld [vmem:[%s2809_s2 + $0x30] sm:$0xff]  ;;  %p402_p1 = scmp.lt.s32.totalorder %s2245_s9, 1  ;;  %p404_p3 = scmp.lt.s32.totalorder %s2241_s30, 2  ;;  %v436_v10 = vlaneseq }
  0x3c   : > { %v1869_v1 = vld [vmem:[%s2809_s2 + $0xb8] sm:$0xff]  ;;  %1932 = vmatpush.bf16.msra.mxu1 %v1853_v0  ;;  %663 = vmatpush.bf16.msra.mxu0 %v1853_v0  ;;  %v1868_v3 = vld [vmem:[%s2809_s2 + $0xb0] sm:$0xff]  ;;  %v1851_v4 = vld [vmem:[%s2809_s2 + $0x28] sm:$0xff]  ;;  %v2263_v47 = vmov 0   ;;  %s2850_s22 = sld [smem:[#allocation19_spill]]  ;;  %s1551_s12 = sshll.u32 %s2430_s6, 5 }
  0x3d   : > { %711 = vmatpush.bf16.msra.mxu2 %v1869_v1  ;;  %v1867_v5 = vld [vmem:[%s2809_s2 + $0xa8] sm:$0xff]  ;;  %v1850_v6 = vld [vmem:[%s2809_s2 + $0x20] sm:$0xff]  ;;  %s2471_s19 = scalar_select %p402_p1, %s2245_s9, 1  ;;  %v1849_v8 = vld [vmem:[%s2809_s2 + $0x18] sm:$0xff]  ;;  %v2496_v18 = vshrl.u32 %v436_v10, 7  ;;  %2059 = vset.pattern.permute.xlu0 %v2263_v47 }
  0x3e   : > { %v1866_v7 = vld [vmem:[%s2809_s2 + $0xa0] sm:$0xff]  ;;  %v2477_v9 = vld [vmem:[%s2434_s8 + $0x10] sm:$0xff]   ;;  %s405_s7 = scalar_select %p404_p3, %s2241_s30, 2  ;;  %v1865_v11 = vld [vmem:[%s2809_s2 + $0x98] sm:$0xff]  ;;  %2060 = vset.pattern.permute.xlu1 %v2263_v47  ;;  %2061 = vset.pattern.permute.xlu2 %v2263_v47 }
  0x3f   : > { %v2484_v12 = vld [vmem:[%s2434_s8 + $0x8] sm:$0xff]   ;;  %v2487_v13 = vld [vmem:[%s2434_s8] sm:$0xff]   ;;  %v1928_v14 = vunpack.c.l.bf16 %v2477_v9  ;;  %v1929_v15 = vunpack.c.h.bf16 %v2477_v9  ;;  %s1953_s27 = smul.u32 18, %s2471_s19  ;;  %v1848_v16 = vld [vmem:[%s2809_s2 + $0x10] sm:$0xff]  ;;  %vm438_vm0 = vcmp.lt.s32.totalorder %v2496_v18, 1  ;;  %vm451_vm1 = vcmp.lt.s32.totalorder %v2496_v18, 7 }
  0x40   : > { %1933 = vmatpush.bf16.msra.mxu1 %v1852_v2  ;;  %664 = vmatpush.bf16.msra.mxu0 %v1852_v2  ;;  %v1925_v17 = vunpack.c.h.bf16 %v2484_v12  ;;  %v1920_v19 = vunpack.c.l.bf16 %v2487_v13  ;;  %s1952_s16 = smul.u32 6, %s405_s7  ;;  %v1864_v20 = vld [vmem:[%s2809_s2 + $0x90] sm:$0xff]  ;;  %v1921_v21 = vunpack.c.h.bf16 %v2487_v13  ;;  %v1924_v22 = vunpack.c.l.bf16 %v2484_v12  ;;  %v1847_v25 = vld [vmem:[%s2809_s2 + $0x8] sm:$0xff]  ;;  %v1846_v34 = vld [vmem:[%s2809_s2] sm:$0xff]  ;;  %s2851_s3 = sld [smem:[#allocation21_spill]] }
  0x41   : > { %712 = vmatpush.bf16.msra.mxu2 %v1868_v3  ;;  %v434_v23 = vrot.slane %v1928_v14, 7  ;;  %v435_v24 = vrot.slane %v1929_v15, 7  ;;  %v1863_v28 = vld [vmem:[%s2809_s2 + $0x88] sm:$0xff]  ;;  %v1861_v38 = vld [vmem:[%s2809_s2 + $0x78] sm:$0xff]  ;;  %v1862_v39 = vld [vmem:[%s2809_s2 + $0x80] sm:$0xff]  ;;  %v449_v52 = vrot.slane %v1928_v14, 1 }
  0x42   : > { %v433_v26 = vrot.slane %v1925_v17, 7  ;;  %v2512_v27 = vrot.slane %v1920_v19, 1  ;;  %s408_s18 = sadd.s32 %s1953_s27, %s1952_s16  ;;  %v446_v29 = vrot.slane %v1921_v21, 1  ;;  %v447_v30 = vrot.slane %v1924_v22, 1  ;;  %v1860_v45 = vld [vmem:[%s2809_s2 + $0x70] sm:$0xff]  ;;  %v1859_v48 = vld [vmem:[%s2809_s2 + $0x68] sm:$0xff] }
  0x43   : > { %v430_v31 = vrot.slane %v1920_v19, 7  ;;  %v431_v32 = vrot.slane %v1921_v21, 7  ;;  %v439_v33 = vsel %vm438_vm0, %v434_v23, %v435_v24  ;;  %s1552_s20 = sshll.u32 %s408_s18, 3  ;;  %v432_v49 = vrot.slane %v1924_v22, 7  ;;  %v1858_v50 = vld [vmem:[%s2809_s2 + $0x60] sm:$0xff]  ;;  %v1857_v55 = vld [vmem:[%s2809_s2 + $0x58] sm:$0xff] }
  0x44   : > { %1934 = vmatpush.bf16.msra.mxu1 %v1851_v4  ;;  %665 = vmatpush.bf16.msra.mxu0 %v1851_v4  ;;  %v440_v35 = vsel %vm438_vm0, %v433_v26, %v434_v23  ;;  %v455_v40 = vsel %vm451_vm1, %v446_v29, %v447_v30  ;;  %v456_v41 = vsel %vm451_vm1, %v2512_v27, %v446_v29  ;;  %s2543_s5 = scalar_lea.vmem %s2808_s1, %s1552_s20  ;;  %v448_v51 = vrot.slane %v1925_v17, 1  ;;  %v1856_v62 = vld [vmem:[%s2809_s2 + $0x50] sm:$0xff]  ;;  %v1855_v63 = vld [vmem:[%s2809_s2 + $0x48] sm:$0xff]  ;;  %v1854_v1 = vld [vmem:[%s2809_s2 + $0x40] sm:$0xff]  ;;  %s2852_s10 = sld [smem:[#allocation23_spill]] }
  0x45   : > { %713 = vmatpush.bf16.msra.mxu2 %v1867_v5  ;;  %v443_v36 = vsel %vm438_vm0, %v430_v31, %v431_v32  ;;  %v444_v37 = vsel %vm438_vm0, %v435_v24, %v430_v31  ;;  %v464_v42 = vpack.c.bf16 %v439_v33, %v440_v35  ;;  %v460_v44 = vpack.c.bf16 %v455_v40, %v456_v41  ;;  %v412_v46 = vld [vmem:[%s2543_s5] sm:$0xff]  ;;  %v417_v60 = vld [vmem:[%s2543_s5 + $0x28] sm:$0xff]  ;;  %v414_v0 = vld [vmem:[%s2543_s5 + $0x10] sm:$0xff]  ;;  %s2753_s16 = scalar_lea.vmem [#allocation8], %s1551_s12  ;;  %s1954_s8 = smul.u32 12, %s2245_s9 }
  0x46   : > { %v458_v43 = vpack.c.bf16 %v443_v36, %v444_v37  ;;  %737 = vperm.xlu0 %2059, %v412_v46   ;;  %v441_v53 = vsel %vm438_vm0, %v432_v49, %v433_v26  ;;  %v442_v54 = vsel %vm438_vm0, %v431_v32, %v432_v49  ;;  %v453_v56 = vsel %vm451_vm1, %v448_v51, %v449_v52  ;;  %v413_v61 = vld [vmem:[%s2543_s5 + $0x8] sm:$0xff]  ;;  %v1883_v14 = vld [vmem:[#allocation5 + $0x68] sm:$0xff]  ;;  %v1880_v19 = vld [vmem:[#allocation5 + $0x50] sm:$0xff]  ;;  %s1842_s15 = sshll.u32 %s2241_s30, 2  ;;  %s2853_s25 = sld [smem:[#allocation24_spill]] }
  0x47   : > { %v454_v57 = vsel %vm451_vm1, %v447_v30, %v448_v51  ;;  %v461_v58 = vpack.c.bf16 %v441_v53, %v442_v54  ;;  %762 = vperm.xlu1 %2060, %v417_v60   ;;  %v450_v2 = vrot.slane %v1929_v15, 1  ;;  %v1893_v10 = vld [vmem:[#allocation5 + $0xb8] sm:$0xff]  ;;  %v1882_v15 = vld [vmem:[#allocation5 + $0x60] sm:$0xff]  ;;  %v1891_v17 = vld [vmem:[#allocation5 + $0xa8] sm:$0xff]  ;;  %s1405_s21 = sadd.s32 %s1954_s8, %s1842_s15  ;;  %s1408_s26 = sshll.u32 %s2753_s16, 4  ;;  %s1409_s26 = int_to_ptr.vmem [resolvable:$true] %s1408_s26 }
  0x48   : > { %1935 = vmatpush.bf16.msra.mxu1 %v1850_v6  ;;  %666 = vmatpush.bf16.msra.mxu0 %v1850_v6  ;;  %v463_v59 = vpack.c.bf16 %v453_v56, %v454_v57  ;;  %v415_v6 = vld [vmem:[%s2543_s5 + $0x18] sm:$0xff]  ;;  %v1878_v22 = vld [vmem:[#allocation5 + $0x40] sm:$0xff]  ;;  %v1888_v23 = vld [vmem:[#allocation5 + $0x90] sm:$0xff]  ;;  %s1843_s14 = sshll.u32 %s1405_s21, 3  ;;  %s1394_s30 = scalar_lea.sflag [#allocation4], %s2430_s6 }
  0x49   : > { %714 = vmatpush.bf16.msra.mxu2 %v1866_v7  ;;  %v452_v3 = vsel %vm451_vm1, %v449_v52, %v450_v2  ;;  %v457_v4 = vsel %vm451_vm1, %v450_v2, %v2512_v27  ;;  %752 = vperm.xlu2 %2061, %v415_v6   ;;  %v416_v7 = vld [vmem:[%s2543_s5 + $0x20] sm:$0xff]  ;;  %v1887_v26 = vld [vmem:[#allocation5 + $0x88] sm:$0xff]  ;;  %v1886_v30 = vld [vmem:[#allocation5 + $0x80] sm:$0xff] }
  0x4a   : > { %v466_v5 = vpack.c.bf16 %v457_v4, %v452_v3  ;;  %v1876_v29 = vld [vmem:[#allocation5 + $0x30] sm:$0xff]  ;;  %v1875_v32 = vld [vmem:[#allocation5 + $0x28] sm:$0xff]  ;;  %v1874_v37 = vld [vmem:[#allocation5 + $0x20] sm:$0xff] }
  0x4b   : > { %v2599_v31 = vld [vmem:[%s2850_s22] ss:$0 sm:$0xff]  ;;  %v1873_v41 = vld [vmem:[#allocation5 + $0x18] sm:$0xff]  ;;  %v1871_v54 = vld [vmem:[#allocation5 + $0x8] sm:$0xff] }
  0x4c   : > { %1936 = vmatpush.bf16.msra.mxu1 %v1849_v8  ;;  %667 = vmatpush.bf16.msra.mxu0 %v1849_v8  ;;  %v1885_v8 = vld [vmem:[#allocation5 + $0x78] sm:$0xff]  ;;  %v1872_v47 = vld [vmem:[#allocation5 + $0x10] sm:$0xff]  ;;  %v1870_v57 = vld [vmem:[#allocation5] sm:$0xff]  ;;  %s1407_s23 = scalar_lea.hbm %s2853_s25, %s1843_s14  ;;  %s2175_s7 = scalar_lea.hbm %s2853_s25, 192 }
  0x4d   : > { %715 = vmatpush.bf16.msra.mxu2 %v1865_v11  ;;  %v1884_v11 = vld [vmem:[#allocation5 + $0x70] sm:$0xff]  ;;  %s1410_s13 = sshll.u32 %s1407_s23, 4  ;;  %s1411_s13 = int_to_ptr.hbm [resolvable:$true] %s1410_s13 }
  0x4e   : > { %742 = vperm.xlu0 %2059, %v413_v61   ;;  %s2169_s9 = sshra.s32 %s1411_s13, 4  ;;  %s2170_s9 = int_to_ptr.hbm [resolvable:$true] %s2169_s9 }
  0x4f   : > { %747 = vperm.xlu1 %2060, %v414_v0   ;;  %s2171_s19 = scalar_lea.hbm %s2170_s9, 32  ;;  %p2176_p12 = scmp.lt.s32.totalorder %s2170_s9, %s2853_s25 }
  0x50   : > { %1937 = vmatpush.bf16.msra.mxu1 %v1848_v16  ;;  %668 = vmatpush.bf16.msra.mxu0 %v1848_v16  ;;  %v1881_v16 = vld [vmem:[#allocation5 + $0x58] sm:$0xff]  ;;  %p2172_p7 = scmp.ne.s32.totalorder %s2170_s9, %s2171_s19  ;;  %p2177_p13 = scmp.lt.s32.totalorder %s2175_s7, %s2171_s19 }
  0x51   : > { %716 = vmatpush.bf16.msra.mxu2 %v1864_v20  ;;  %757 = vperm.xlu2 %2061, %v416_v7   ;;  %v1889_v20 = vld [vmem:[#allocation5 + $0x98] sm:$0xff] }
  0x52   : > { %p2173_p10 = pnand %p2172_p7, %p2406_p2  ;;  %p2178_p0 = por %p2177_p13, %p2176_p12 }
  0x54   : > { %1938 = vmatpush.bf16.msra.mxu1 %v1847_v25  ;;  %669 = vmatpush.bf16.msra.mxu0 %v1847_v25  ;;  %v1877_v25 = vld [vmem:[#allocation5 + $0x38] sm:$0xff]  ;;  %p2174_p11 = pneg %p2173_p10 }
  0x55   : > { %717 = vmatpush.bf16.msra.mxu2 %v1863_v28  ;;  %1006 = vmatpush.bf16.msra.mxu3 %v1877_v25 }
  0x56   : > { %p2179_p4 = pnand %p2178_p0, %p2174_p11 }
  0x58   : > { %1939 = vmatpush.bf16.msra.mxu1 %v1846_v34  ;;  %670 = vmatpush.bf16.msra.mxu0 %v1846_v34 }
  0x59   : > { %718 = vmatpush.bf16.msra.mxu2 %v1862_v39  ;;  %1007 = vmatpush.bf16.msra.mxu3 %v1876_v29 }
  0x5b   : > { %681 = vmatmul.bf16.vlgmr.msra.gmra.mxu1 %v464_v42  ;;  %671 = vmatmul.bf16.vlgmr.msra.gmra.mxu0 %v458_v43 }
  0x5c   : > { %687 = vmatpush.bf16.msrb.mxu1 %v1861_v38  ;;  %719 = vmatmul.bf16.vlgmr.msra.gmra.mxu2 %v460_v44 }
  0x5d   : > { %1030 = vmatpush.bf16.msrb.mxu0 %v1885_v8  ;;  %1008 = vmatpush.bf16.msra.mxu3 %v1875_v32 }
  0x60   : > { %688 = vmatpush.bf16.msrb.mxu1 %v1860_v45 }
  0x61   : > { %1031 = vmatpush.bf16.msrb.mxu0 %v1884_v11  ;;  %1009 = vmatpush.bf16.msra.mxu3 %v1874_v37 }
  0x64   : > { %689 = vmatpush.bf16.msrb.mxu1 %v1859_v48 }
  0x65   : > { %1032 = vmatpush.bf16.msrb.mxu0 %v1883_v14  ;;  %1010 = vmatpush.bf16.msra.mxu3 %v1873_v41 }
  0x68   : > { %690 = vmatpush.bf16.msrb.mxu1 %v1858_v50 }
  0x69   : > { %1033 = vmatpush.bf16.msrb.mxu0 %v1882_v15  ;;  %1011 = vmatpush.bf16.msra.mxu3 %v1872_v47 }
  0x6b   : > { %676 = vmatmul.bf16.gmra.mxu0 %v461_v58 }
  0x6c   : > { %691 = vmatpush.bf16.msrb.mxu1 %v1857_v55  ;;  %724 = vmatmul.bf16.gmra.mxu2 %v463_v59 }
  0x6d   : > { %1034 = vmatpush.bf16.msrb.mxu0 %v1881_v16  ;;  %1012 = vmatpush.bf16.msra.mxu3 %v1871_v54 }
  0x70   : > { %692 = vmatpush.bf16.msrb.mxu1 %v1856_v62 }
  0x71   : > { %1035 = vmatpush.bf16.msrb.mxu0 %v1880_v19  ;;  %1013 = vmatpush.bf16.msra.mxu3 %v1870_v57 }
  0x74   : > { %693 = vmatpush.bf16.msrb.mxu1 %v1855_v63 }
  0x78   : > { %694 = vmatpush.bf16.msrb.mxu1 %v1854_v1 }
  0x7b   : > { %695 = vmatmul.bf16.vlgmr.msrb.gmra.mxu1 %v2487_v13  ;;  %v1892_v13 = vld [vmem:[#allocation5 + $0xb0] sm:$0xff] }
  0x7c   : > { %729 = vmatmul.bf16.gmra.mxu2 %v466_v5  ;;  %1054 = vmatpush.bf16.msra.mxu1 %v1893_v10 }
  0x80   : > { %1055 = vmatpush.bf16.msra.mxu1 %v1892_v13 }
  0x84   : > { %1056 = vmatpush.bf16.msra.mxu1 %v1891_v17 }
  0x8b   : > { %700 = vmatmul.bf16.gmra.mxu1 %v2484_v12  ;;  %v1890_v12 = vld [vmem:[#allocation5 + $0xa0] sm:$0xff] }
  0x8c   : > { %1057 = vmatpush.bf16.msra.mxu1 %v1890_v12 }
  0x90   : > { %1058 = vmatpush.bf16.msra.mxu1 %v1889_v20 }
  0x94   : > { %1059 = vmatpush.bf16.msra.mxu1 %v1888_v23 }
  0x98   : > { %1060 = vmatpush.bf16.msra.mxu1 %v1887_v26 }
  0x9b   : > { %705 = vmatmul.bf16.gmra.mxu1 %v2477_v9  ;;  %v1879_v9 = vld [vmem:[#allocation5 + $0x48] sm:$0xff] }
  0x9c   : > { %1036 = vmatpush.bf16.msrb.mxu0 %v1879_v9  ;;  %1061 = vmatpush.bf16.msra.mxu1 %v1886_v30 }
  0xa0   : > { %1037 = vmatpush.bf16.msrb.mxu0 %v1878_v22 }
  0xa3   : > { %v2623_v6 = vpop.permute.xlu2 %752 }
  0xab   : > { %v2633_v23 = vpop.permute.xlu2 %757 }
  0xb8   : > { %v2602_v36 = vpop.permute.xlu0 %737 }
  0xb9   : > { %v2605_v43 = vpop.permute.xlu1 %762 }
  0xc0   : > { %v2607_v48 = vpop.permute.xlu0 %742 }
  0xc1   : > { %v2618_v61 = vpop.permute.xlu1 %747 }
  0xd8   : > { %v2592_v21 = vpop.f32.mrf.mxu1  ;;  %v672_v24 = vpop.f32.mrf.mxu0 }
  0xd9   : > { %v673_v34 = vadd.f32 %v2599_v31, %v672_v24  ;;  %v683_v17 = vadd.f32 %v2599_v31, %v2592_v21 }
  0xdf   : > { %v720_v28 = vpop.f32.mrf.mxu2 }
  0xe0   : > { %v2594_v27 = vpop.f32.mrf.mxu1  ;;  %v674_v33 = vpop.f32.mrf.mxu0 }
  0xe1   : > { %v675_v40 = vadd.f32 %v2599_v31, %v674_v33  ;;  %v685_v26 = vadd.f32 %v2599_v31, %v2594_v27 }
  0xe7   : > { %v722_v38 = vpop.f32.mrf.mxu2 }
  0xe8   : > { %v677_v45 = vpop.f32.mrf.mxu0 }
  0xe9   : > { %v678_v53 = vadd.f32 %v2599_v31, %v677_v45 }
  0xef   : > { %v725_v51 = vpop.f32.mrf.mxu2 }
  0xf0   : > { %v679_v62 = vpop.f32.mrf.mxu0 }
  0xf1   : > { %v680_v1 = vadd.f32 %v2599_v31, %v679_v62  ;;  %v1909_v62 = vld [vmem:[#allocation7 + $0x78] sm:$0xff] }
  0xf2   : > { %1341 = vmatpush.bf16.msrb.mxu3 %v1909_v62 }
  0xf7   : > { %v727_v2 = vpop.f32.mrf.mxu2 }
  0xf8   : > { %v696_v35 = vpop.f32.mrf.mxu1 }
  0xf9   : > { %v697_v39 = vadd.f32 %v696_v35, %v673_v34 }
  0xfb   : > { %v721_v42 = vadd.f32 %v720_v28, %v697_v39 }
  0xfd   : > { %v765_v49 = vmul.f32 %v2602_v36, %v721_v42 }
  0xff   : > { %v2612_v55 = vmax.f32 %v765_v49, 0.0  ;;  %v730_v12 = vpop.f32.mrf.mxu2 }
 0x100   : > { %v698_v44 = vpop.f32.mrf.mxu1 }
 0x101   : > { %v699_v46 = vadd.f32 %v698_v44, %v675_v40  ;;  %v789_v7 = vrot.slane %v2612_v55, 1  ;;  %v777_v31 = vrot.slane %v2612_v55, 7 }
 0x103   : > { %v723_v50 = vadd.f32 %v722_v38, %v699_v46 }
 0x105   : > { %v766_v52 = vmul.f32 %v2607_v48, %v723_v50 }
 0x107   : > { %v2614_v56 = vmax.f32 %v766_v52, 0.0  ;;  %v732_v21 = vpop.f32.mrf.mxu2 }
 0x108   : > { %v701_v58 = vpop.f32.mrf.mxu1 }
 0x109   : > { %v702_v59 = vadd.f32 %v701_v58, %v678_v53  ;;  %v802_v60 = vpack.c.bf16 %v2614_v56, %v2612_v55  ;;  %v790_v3 = vrot.slane %v2614_v56, 1  ;;  %v778_v40 = vrot.slane %v2614_v56, 7 }
 0x10b   : > { %v726_v63 = vadd.f32 %v725_v51, %v702_v59  ;;  %1038 = vmatmul.bf16.vlgmr.msrb.gmra.mxu0 %v802_v60  ;;  %v799_v15 = vsel %vm451_vm1, %v789_v7, %v790_v3  ;;  %v787_v44 = vsel %vm438_vm0, %v777_v31, %v778_v40 }
 0x10d   : > { %v767_v0 = vmul.f32 %v2618_v61, %v726_v63  ;;  %v1908_v63 = vld [vmem:[#allocation7 + $0x70] sm:$0xff] }
 0x10e   : > { %1342 = vmatpush.bf16.msrb.mxu3 %v1908_v63 }
 0x10f   : > { %v773_v4 = vmax.f32 %v767_v0, 0.0  ;;  %v1907_v0 = vld [vmem:[#allocation7 + $0x68] sm:$0xff] }
 0x110   : > { %v703_v5 = vpop.f32.mrf.mxu1 }
 0x111   : > { %v791_v8 = vrot.slane %v773_v4, 1  ;;  %v704_v10 = vadd.f32 %v703_v5, %v680_v1  ;;  %v779_v53 = vrot.slane %v773_v4, 7  ;;  %v2661_v1 = vld [vmem:[#allocation7 + $0xb8] sm:$0xff]  ;;  %v2667_v5 = vld [vmem:[#allocation7 + $0xa8] sm:$0xff] }
 0x112   : > { %1343 = vmatpush.bf16.msrb.mxu3 %v1907_v0  ;;  %1363 = vmatpush.bf16.msra.mxu0 %v2661_v1 }
 0x113   : > { %v728_v11 = vadd.f32 %v727_v2, %v704_v10  ;;  %v798_v14 = vsel %vm451_vm1, %v790_v3, %v791_v8  ;;  %v786_v55 = vsel %vm438_vm0, %v778_v40, %v779_v53  ;;  %v1906_v2 = vld [vmem:[#allocation7 + $0x60] sm:$0xff]  ;;  %v2664_v3 = vld [vmem:[#allocation7 + $0xb0] sm:$0xff]  ;;  %v1903_v10 = vld [vmem:[#allocation7 + $0x48] sm:$0xff] }
 0x114   : > { %v803_v13 = vpack.c.bf16 %v798_v14, %v799_v15  ;;  %v1902_v14 = vld [vmem:[#allocation7 + $0x40] sm:$0xff]  ;;  %v1901_v15 = vld [vmem:[#allocation7 + $0x38] sm:$0xff] }
 0x115   : > { %v768_v16 = vmul.f32 %v2623_v6, %v728_v11  ;;  %v2673_v11 = vld [vmem:[#allocation7 + $0x98] sm:$0xff]  ;;  %1319 = vmatpush.bf16.msrb.mxu2 %v1901_v15 }
 0x116   : > { %1062 = vmatmul.bf16.vlgmr.msra.gmra.mxu1 %v803_v13  ;;  %1344 = vmatpush.bf16.msrb.mxu3 %v1906_v2  ;;  %v2676_v13 = vld [vmem:[#allocation7 + $0x90] sm:$0xff] }
 0x117   : > { %v774_v19 = vmax.f32 %v768_v16, 0.0  ;;  %1364 = vmatpush.bf16.msra.mxu0 %v2664_v3  ;;  %v1900_v16 = vld [vmem:[#allocation7 + $0x30] sm:$0xff] }
 0x118   : > { %v706_v9 = vpop.f32.mrf.mxu1 }
 0x119   : > { %v707_v20 = vadd.f32 %v706_v9, %v683_v17  ;;  %v805_v22 = vpack.c.bf16 %v774_v19, %v773_v4  ;;  %v792_v29 = vrot.slane %v774_v19, 1  ;;  %v780_v52 = vrot.slane %v774_v19, 7  ;;  %v1905_v4 = vld [vmem:[#allocation7 + $0x58] sm:$0xff]  ;;  %v2679_v17 = vld [vmem:[#allocation7 + $0x88] sm:$0xff]  ;;  %1320 = vmatpush.bf16.msrb.mxu2 %v1900_v16 }
 0x11a   : > { %1345 = vmatpush.bf16.msrb.mxu3 %v1905_v4  ;;  %v1899_v9 = vld [vmem:[#allocation7 + $0x28] sm:$0xff] }
 0x11b   : > { %v731_v24 = vadd.f32 %v730_v12, %v707_v20  ;;  %1043 = vmatmul.bf16.gmra.mxu0 %v805_v22  ;;  %v797_v37 = vsel %vm451_vm1, %v791_v8, %v792_v29  ;;  %v785_v54 = vsel %vm438_vm0, %v779_v53, %v780_v52  ;;  %v2670_v8 = vld [vmem:[#allocation7 + $0xa0] sm:$0xff]  ;;  %v2687_v22 = vld [vmem:[%s2851_s3] ss:$0 sm:$0xff] }
 0x11c   : > { %v804_v56 = vpack.c.bf16 %v785_v54, %v786_v55  ;;  %1365 = vmatpush.bf16.msra.mxu0 %v2667_v5  ;;  %v2682_v20 = vld [vmem:[#allocation7 + $0x80] sm:$0xff] }
 0x11d   : > { %v769_v25 = vmul.f32 %v2633_v23, %v731_v24  ;;  %1321 = vmatpush.bf16.msrb.mxu2 %v1899_v9  ;;  %v1898_v24 = vld [vmem:[#allocation7 + $0x20] sm:$0xff] }
 0x11f   : > { %v775_v28 = vmax.f32 %v769_v25, 0.0 }
 0x120   : > { %v708_v30 = vpop.f32.mrf.mxu1  ;;  %1366 = vmatpush.bf16.msra.mxu0 %v2670_v8 }
 0x121   : > { %v793_v32 = vrot.slane %v775_v28, 1  ;;  %v709_v33 = vadd.f32 %v708_v30, %v685_v26  ;;  %v781_v57 = vrot.slane %v775_v28, 7  ;;  %1322 = vmatpush.bf16.msrb.mxu2 %v1898_v24 }
 0x123   : > { %v733_v34 = vadd.f32 %v732_v21, %v709_v33  ;;  %v796_v35 = vsel %vm451_vm1, %v792_v29, %v793_v32  ;;  %v784_v59 = vsel %vm438_vm0, %v780_v52, %v781_v57 }
 0x124   : > { %v806_v38 = vpack.c.bf16 %v796_v35, %v797_v37  ;;  %1367 = vmatpush.bf16.msra.mxu0 %v2673_v11  ;;  %v1896_v35 = vld [vmem:[#allocation7 + $0x10] sm:$0xff] }
 0x125   : > { %v770_v39 = vmul.f32 %v2605_v43, %v733_v34 }
 0x126   : > { %1067 = vmatmul.bf16.gmra.mxu1 %v806_v38 }
 0x127   : > { %v776_v27 = vmax.f32 %v770_v39, 0.0 }
 0x128   : > { %1368 = vmatpush.bf16.msra.mxu0 %v2676_v13 }
 0x129   : > { %v808_v41 = vpack.c.bf16 %v776_v27, %v775_v28  ;;  %v782_v42 = vrot.slane %v776_v27, 7  ;;  %v794_v47 = vrot.slane %v776_v27, 1  ;;  %v1895_v27 = vld [vmem:[#allocation7 + $0x8] sm:$0xff] }
 0x12b   : > { %1048 = vmatmul.bf16.gmra.mxu0 %v808_v41  ;;  %v788_v45 = vsel %vm438_vm0, %v782_v42, %v777_v31  ;;  %v795_v49 = vsel %vm451_vm1, %v793_v32, %v794_v47  ;;  %v800_v50 = vsel %vm451_vm1, %v794_v47, %v789_v7  ;;  %v783_v58 = vsel %vm438_vm0, %v781_v57, %v782_v42  ;;  %v1904_v7 = vld [vmem:[#allocation7 + $0x50] sm:$0xff]  ;;  %v1897_v32 = vld [vmem:[#allocation7 + $0x18] sm:$0xff]  ;;  %v1894_v47 = vld [vmem:[#allocation7] sm:$0xff] }
 0x12c   : > { %v801_v46 = vpack.c.bf16 %v787_v44, %v788_v45  ;;  %v809_v51 = vpack.c.bf16 %v800_v50, %v795_v49  ;;  %v807_v60 = vpack.c.bf16 %v783_v58, %v784_v59  ;;  %1346 = vmatpush.bf16.msrb.mxu3 %v1904_v7  ;;  %1369 = vmatpush.bf16.msra.mxu0 %v2679_v17 }
 0x12d   : > { %1323 = vmatpush.bf16.msrb.mxu2 %v1897_v32 }
 0x12e   : > { %1014 = vmatmul.bf16.vlgmr.msra.gmra.mxu3 %v801_v46 }
 0x130   : > { %1347 = vmatpush.bf16.msrb.mxu3 %v1903_v10  ;;  %1370 = vmatpush.bf16.msra.mxu0 %v2682_v20 }
 0x131   : > { %1324 = vmatpush.bf16.msrb.mxu2 %v1896_v35 }
 0x134   : > { %1348 = vmatpush.bf16.msrb.mxu3 %v1902_v14 }
 0x135   : > { %1325 = vmatpush.bf16.msrb.mxu2 %v1895_v27 }
 0x136   : > { %1072 = vmatmul.bf16.gmra.mxu1 %v809_v51 }
 0x139   : > { %1326 = vmatpush.bf16.msrb.mxu2 %v1894_v47 }
 0x13d   : > { %1940 = vmatpush.bf16.msra.mxu2 %v2661_v1 }
 0x13e   : > { %1019 = vmatmul.bf16.gmra.mxu3 %v804_v56 }
 0x141   : > { %1941 = vmatpush.bf16.msra.mxu2 %v2664_v3 }
 0x145   : > { %1942 = vmatpush.bf16.msra.mxu2 %v2667_v5 }
 0x149   : > { %1943 = vmatpush.bf16.msra.mxu2 %v2670_v8 }
 0x14d   : > { %1944 = vmatpush.bf16.msra.mxu2 %v2673_v11 }
 0x14e   : > { %1024 = vmatmul.bf16.gmra.mxu3 %v807_v60 }
 0x151   : > { %1945 = vmatpush.bf16.msra.mxu2 %v2676_v13 }
 0x155   : > { %1946 = vmatpush.bf16.msra.mxu2 %v2679_v17 }
 0x159   : > { %1947 = vmatpush.bf16.msra.mxu2 %v2682_v20 }
 0x188   : > { %v1039_v19 = vpop.f32.mrf.mxu0 }
 0x190   : > { %v1041_v28 = vpop.f32.mrf.mxu0 }
 0x193   : > { %v1063_v12 = vpop.f32.mrf.mxu1 }
 0x198   : > { %v1044_v38 = vpop.f32.mrf.mxu0 }
 0x19b   : > { %v1065_v29 = vpop.f32.mrf.mxu1 }
 0x1a0   : > { %v1046_v51 = vpop.f32.mrf.mxu0 }
 0x1a3   : > { %v1068_v31 = vpop.f32.mrf.mxu1 }
 0x1a8   : > { %v1049_v4 = vpop.f32.mrf.mxu0 }
 0x1ab   : > { %v1070_v53 = vpop.f32.mrf.mxu1 }
 0x1b1   : > { %v1015_v25 = vpop.f32.mrf.mxu3 }
 0x1b2   : > { %v1016_v26 = vadd.f32 %v2687_v22, %v1015_v25 }
 0x1b3   : > { %v1073_v14 = vpop.f32.mrf.mxu1 }
 0x1b4   : > { %v1040_v30 = vadd.f32 %v1039_v19, %v1016_v26  ;;  %v1051_v26 = vpop.f32.mrf.mxu0 }
 0x1b6   : > { %v1064_v21 = vadd.f32 %v1063_v12, %v1040_v30 }
 0x1b8   : > { %v1078_v39 = vmul.f32 %v1064_v21, %v2602_v36 }
 0x1b9   : > { %v1017_v33 = vpop.f32.mrf.mxu3 }
 0x1ba   : > { %v1018_v34 = vadd.f32 %v2687_v22, %v1017_v33  ;;  %v2694_v44 = vmax.f32 %v1078_v39, 0.0 }
 0x1bb   : > { %v1075_v30 = vpop.f32.mrf.mxu1 }
 0x1bc   : > { %v1042_v37 = vadd.f32 %v1041_v28, %v1018_v34  ;;  %v1102_v58 = vrot.slane %v2694_v44, 1  ;;  %v1090_v35 = vrot.slane %v2694_v44, 7 }
 0x1be   : > { %v1066_v40 = vadd.f32 %v1065_v29, %v1042_v37 }
 0x1c0   : > { %v1079_v41 = vmul.f32 %v1066_v40, %v2607_v48 }
 0x1c1   : > { %v1020_v42 = vpop.f32.mrf.mxu3 }
 0x1c2   : > { %v2696_v45 = vmax.f32 %v1079_v41, 0.0  ;;  %v1021_v46 = vadd.f32 %v2687_v22, %v1020_v42 }
 0x1c4   : > { %v1045_v49 = vadd.f32 %v1044_v38, %v1021_v46  ;;  %v1115_v50 = vpack.c.bf16 %v2696_v45, %v2694_v44  ;;  %v1103_v55 = vrot.slane %v2696_v45, 1  ;;  %v1091_v34 = vrot.slane %v2696_v45, 7 }
 0x1c6   : > { %v1069_v36 = vadd.f32 %v1068_v31, %v1045_v49  ;;  %1349 = vmatmul.bf16.vlgmr.msrb.gmra.mxu3 %v1115_v50  ;;  %v1112_v0 = vsel %vm451_vm1, %v1102_v58, %v1103_v55  ;;  %v1100_v38 = vsel %vm438_vm0, %v1090_v35, %v1091_v34 }
 0x1c8   : > { %v1080_v52 = vmul.f32 %v1069_v36, %v2618_v61 }
 0x1c9   : > { %v1022_v54 = vpop.f32.mrf.mxu3 }
 0x1ca   : > { %v1086_v56 = vmax.f32 %v1080_v52, 0.0  ;;  %v1023_v57 = vadd.f32 %v2687_v22, %v1022_v54 }
 0x1cc   : > { %v1104_v59 = vrot.slane %v1086_v56, 1  ;;  %v1047_v60 = vadd.f32 %v1046_v51, %v1023_v57  ;;  %v1092_v40 = vrot.slane %v1086_v56, 7 }
 0x1ce   : > { %v1071_v62 = vadd.f32 %v1070_v53, %v1047_v60  ;;  %v1111_v63 = vsel %vm451_vm1, %v1103_v55, %v1104_v59  ;;  %v1099_v20 = vsel %vm438_vm0, %v1091_v34, %v1092_v40  ;;  %v2064_v60 = vld [vmem:[%s2852_s10] ss:$0 sm:$0xff] }
 0x1cf   : > { %v1116_v1 = vpack.c.bf16 %v1111_v63, %v1112_v0 }
 0x1d0   : > { %v1081_v2 = vmul.f32 %v1071_v62, %v2623_v6 }
 0x1d1   : > { %v1025_v3 = vpop.f32.mrf.mxu3  ;;  %1371 = vmatmul.bf16.vlgmr.msra.gmra.mxu0 %v1116_v1 }
 0x1d2   : > { %v1026_v7 = vadd.f32 %v2687_v22, %v1025_v3  ;;  %v1087_v10 = vmax.f32 %v1081_v2, 0.0 }
 0x1d4   : > { %v1050_v15 = vadd.f32 %v1049_v4, %v1026_v7  ;;  %v1118_v16 = vpack.c.bf16 %v1087_v10, %v1086_v56  ;;  %v1105_v25 = vrot.slane %v1087_v10, 1 }
 0x1d6   : > { %v1074_v19 = vadd.f32 %v1073_v14, %v1050_v15  ;;  %1353 = vmatmul.bf16.gmra.mxu3 %v1118_v16  ;;  %v1110_v11 = vsel %vm451_vm1, %v1104_v59, %v1105_v25 }
 0x1d8   : > { %v1082_v12 = vmul.f32 %v1074_v19, %v2633_v23 }
 0x1d9   : > { %v1027_v5 = vpop.f32.mrf.mxu3 }
 0x1da   : > { %v1088_v9 = vmax.f32 %v1082_v12, 0.0  ;;  %v1028_v24 = vadd.f32 %v2687_v22, %v1027_v5 }
 0x1dc   : > { %v1052_v28 = vadd.f32 %v1051_v26, %v1028_v24  ;;  %v1106_v29 = vrot.slane %v1088_v9, 1  ;;  %v1094_v41 = vrot.slane %v1088_v9, 7 }
 0x1de   : > { %v1076_v8 = vadd.f32 %v1075_v30, %v1052_v28  ;;  %v1109_v32 = vsel %vm451_vm1, %v1105_v25, %v1106_v29 }
 0x1df   : > { %v1119_v33 = vpack.c.bf16 %v1109_v32, %v1110_v11 }
 0x1e0   : > { %v1083_v21 = vmul.f32 %v1076_v8, %v2605_v43  ;;  %v1093_v43 = vrot.slane %v1087_v10, 7 }
 0x1e1   : > { %1375 = vmatmul.bf16.gmra.mxu0 %v1119_v33 }
 0x1e2   : > { %v1089_v22 = vmax.f32 %v1083_v21, 0.0  ;;  %v1098_v27 = vsel %vm438_vm0, %v1092_v40, %v1093_v43  ;;  %v1097_v45 = vsel %vm438_vm0, %v1093_v43, %v1094_v41 }
 0x1e3   : > { %v1117_v31 = vpack.c.bf16 %v1098_v27, %v1099_v20 }
 0x1e4   : > { %v1121_v13 = vpack.c.bf16 %v1089_v22, %v1088_v9  ;;  %v1095_v37 = vrot.slane %v1089_v22, 7  ;;  %v1107_v47 = vrot.slane %v1089_v22, 1 }
 0x1e6   : > { %1358 = vmatmul.bf16.gmra.mxu3 %v1121_v13  ;;  %v1101_v39 = vsel %vm438_vm0, %v1095_v37, %v1090_v35  ;;  %v1096_v42 = vsel %vm438_vm0, %v1094_v41, %v1095_v37  ;;  %v1108_v49 = vsel %vm451_vm1, %v1106_v29, %v1107_v47  ;;  %v1113_v50 = vsel %vm451_vm1, %v1107_v47, %v1102_v58 }
 0x1e7   : > { %v1114_v17 = vpack.c.bf16 %v1100_v38, %v1101_v39  ;;  %v1120_v46 = vpack.c.bf16 %v1096_v42, %v1097_v45  ;;  %v1122_v36 = vpack.c.bf16 %v1113_v50, %v1108_v49 }
 0x1e9   : > { %1327 = vmatmul.bf16.vlgmr.msrb.gmra.mxu2 %v1114_v17 }
 0x1f9   : > { %1331 = vmatmul.bf16.gmra.mxu2 %v1117_v31 }
 0x209   : > { %1336 = vmatmul.bf16.gmra.mxu2 %v1120_v46 }
 0x219   : > { %1380 = vmatmul.bf16.vlgmr.msra.gmra.mxu2 %v1122_v36 }
 0x249   : > { %v1350_v51 = vpop.f32.mrf.mxu3 }
 0x24e   : > { %v1372_v52 = vpop.f32.mrf.mxu0 }
 0x251   : > { %v1351_v53 = vpop.f32.mrf.mxu3 }
 0x256   : > { %v1373_v62 = vpop.f32.mrf.mxu0 }
 0x259   : > { %v1354_v54 = vpop.f32.mrf.mxu3 }
 0x25e   : > { %v1376_v4 = vpop.f32.mrf.mxu0 }
 0x261   : > { %v1356_v55 = vpop.f32.mrf.mxu3 }
 0x266   : > { %v1378_v16 = vpop.f32.mrf.mxu0 }
 0x269   : > { %v1359_v56 = vpop.f32.mrf.mxu3 }
 0x26c   : > { %v1328_v57 = vpop.f32.mrf.mxu2 }
 0x271   : > { %v1361_v59 = vpop.f32.mrf.mxu3 }
 0x274   : > { %v1329_v44 = vpop.f32.mrf.mxu2 }
 0x275   : > { %v1330_v63 = vadd.f32 %v2064_v60, %v1329_v44 }
 0x277   : > { %v1352_v18 = vadd.f32 %v1351_v53, %v1330_v63 }
 0x279   : > { %v1374_v58 = vadd.f32 %v1373_v62, %v1352_v18 }
 0x27b   : > { %v1385_v0 = vmul.f32 %v1374_v58, %v2607_v48 }
 0x27c   : > { %v1332_v1 = vpop.f32.mrf.mxu2 }
 0x27d   : > { %1389 = vst [vmem:[%s2753_s16] sm:$0xff] %v1385_v0  ;;  %v1333_v2 = vadd.f32 %v2064_v60, %v1332_v1 }
 0x27f   : > { %v1355_v3 = vadd.f32 %v1354_v54, %v1333_v2 }
 0x281   : > { %v1377_v7 = vadd.f32 %v1376_v4, %v1355_v3 }
 0x283   : > { %v1386_v10 = vmul.f32 %v1377_v7, %v2618_v61 }
 0x284   : > { %v1334_v14 = vpop.f32.mrf.mxu2 }
 0x285   : > { %1390 = vst [vmem:[%s2753_s16 + $0x8] sm:$0xff] %v1386_v10  ;;  %v1335_v15 = vadd.f32 %v2064_v60, %v1334_v14 }
 0x287   : > { %v1357_v48 = vadd.f32 %v1356_v55, %v1335_v15 }
 0x289   : > { %v1379_v19 = vadd.f32 %v1378_v16, %v1357_v48 }
 0x28b   : > { %v1387_v12 = vmul.f32 %v1379_v19, %v2623_v6 }
 0x28c   : > { %v1337_v5 = vpop.f32.mrf.mxu2 }
 0x28d   : > { %1391 = vst [vmem:[%s2753_s16 + $0x10] sm:$0xff] %v1387_v12  ;;  %v1338_v24 = vadd.f32 %v2064_v60, %v1337_v5 }
 0x28f   : > { %v1360_v61 = vadd.f32 %v1359_v56, %v1338_v24 }
 0x294   : > { %v1339_v9 = vpop.f32.mrf.mxu2 }
 0x29c   : > { %v1381_v25 = vpop.f32.mrf.mxu2 }
 0x29d   : > { %v1382_v6 = vadd.f32 %v1381_v25, %v1360_v61 }
 0x29f   : > { %v1388_v26 = vmul.f32 %v1382_v6, %v2633_v23 }
 0x2a1   : > { %1392 = vst [vmem:[%s2753_s16 + $0x18] sm:$0xff] %v1388_v26 }
 0x2a2   : > { %2182 = shalt.err (!%p2179_p4)
}
 0x2a3   : > { %s2264_s6 = smov 128   ;;  %s2265_s27 = smov 8  }
 0x2a4   : > { %1965 = dma.vmem_to_hbm [thread:$0]  (%p2406_p2), %s1409_s26, 512, %s1411_s13, %s1394_s30, %s2264_s6, %s2264_s6, %s2265_s27   ;;  %v1383_v23 = vpop.f32.mrf.mxu2 }
 0x2a5 PF: > { %s2855_s10 = sld [smem:[#allocation14_spill]] }
 0x2a6   : > { %s2856_s12 = sld [smem:[#allocation12_spill]] }
 0x2ab   : > { %p1987_p6 = scmp.ge.s32.totalorder %s2855_s10, 2 }
 0x2ac   : > { %s1425_s8 = sand.u32 1, %s2856_s12  }
 0x2ad   : > { %p1979_p8 = pnand %p1987_p6, %p2368_p5  ;;  %s1426_s15 = scalar_lea.sflag [#allocation4], %s1425_s8 }
 0x2af   : > { %p1980_p9 = pneg %p1979_p8 }
 0x2b1   : > { %2224 = dma.done.wait (%p1980_p9), %s1426_s15, 512  }
 0x2b2   : > { %2226 = vsyncadd (%p1980_p9), %s1426_s15, 4294966784  ;;  %s25_s12 = sadd.s32 1, %s2855_s10   ;;  %s2858_s30 = sld [smem:[#allocation13_spill]] }
 0x2b3   : > { %p22_p1 = scmp.ge.s32.totalorder %s25_s12, 8   ;;  %s2859_s10 = sld [smem:[#allocation16_spill]] }
 0x2b4   : > { %s2860_s21 = sld [smem:[#allocation18_spill]]  ;;  %s2861_s27 = smov %s2233_s28 }
 0x2b5   : > { %s2862_s28 = smov %s2237_s29  ;;  %s2863_s29 = smov %s2419_s17 }
 0x2b6   : > { %s2864_s9 = smov %s2253_s11  ;;  %24 = sbr.rel (!%p22_p1) target bundleno = 15 (0xf), region = 108 }
 0x2ba   : > { %s2865_s11 = smov %s2860_s21 }
 0x2bb   :  { %1432 = vsyncpa [#allocation3], 1 }
 0x2bc   :  { %1434 = vsyncpa [#allocation3 + $0x1], 1 }
 0x2bd   :  { %1435 = vsyncpa [#allocation6], 1 }
 0x2be   :  { %1436 = vsyncpa [#allocation4], 1 }
 0x2bf   :  { %1438 = vsyncpa [#allocation4 + $0x1], 1 }

</bundles_post_ra>
